<compile_context>
chip_gen: v7x
topology: tpu7x:2x2x1
jax: 0.10.0
libtpu: 0.0.40
codegen_flags: <defaults>
</compile_context>

<pallas_src>
import jax
import jax.numpy as jnp
from jax.experimental import pallas as pl
from jax.experimental.pallas import tpu as pltpu


def _accumulate(x_ref, w_ref, acc):
    """FMA-style channel contraction on the VPU.

    x_ref: (TN, C, H0)  w_ref: (TO, C, H0)  acc: (TN, TO, H0) float32.
    The unrolled loop over C avoids materializing a big (·, C, H0) intermediate
    and avoids a sublane-axis reduction (XLU work); each step is a plain VPU
    multiply-add on the f32 accumulator, loading one channel slab per step.
    """
    C = x_ref.shape[1]
    for c in range(C):  # static trip count -> fully unrolled at trace time
        xc = x_ref[:, c, :].astype(jnp.float32)          # (TN, H0)
        wc = w_ref[:, c, :].astype(jnp.float32)          # (TO, H0)
        acc = acc + xc[:, None, :] * wc[None, :, :]      # (TN, TO, H0)
    return acc


def _lc2d_kernel_bias(x_ref, w_ref, b_ref, o_ref):
    acc = jnp.broadcast_to(b_ref[...].astype(jnp.float32)[None, :, :],
                           o_ref.shape)
    o_ref[...] = _accumulate(x_ref, w_ref, acc).astype(o_ref.dtype)


def _lc2d_kernel_nobias(x_ref, w_ref, o_ref):
    acc = jnp.zeros(o_ref.shape, jnp.float32)
    o_ref[...] = _accumulate(x_ref, w_ref, acc).astype(o_ref.dtype)


def locally_connected_2d(x, weight, bias=None, kernel_size=1, stride=1, *,
                         batch_tile=8, out_tile=None):
    """Pallas port of LocallyConnected2d.forward (valid configuration).

    x:      (N, C, H)                          f32 or bf16
    weight: (1, O, C, H_out, 1, kernel**2)     kernel_size must be 1
    bias:   (1, O, H_out, 1) or None
    returns (N, O, H_out) in x.dtype (accumulation is f32 inside the kernel,
    so bf16 inputs halve HBM traffic without losing accumulation precision).
    """
    N, C, H = x.shape
    _, O, Cw, H0, W0, KK = weight.shape
    if not (Cw == C and W0 == 1 and kernel_size == 1 and KK == kernel_size ** 2):
        raise ValueError("forward is only well-formed for 3-D input, kernel_size == 1")
    L = (H - kernel_size) // stride + 1
    if L != H0:
        raise ValueError("weight output_size must match the unfolded length")

    # kernel_size == 1: the double unfold is a strided slice along H.  For
    # stride == 1 (the usual config) this is a no-op that XLA elides; for
    # stride > 1 it is one extra strided copy of x in HBM.
    # TODO(synk): for stride > 1, fold the stride into the kernel's x load
    # (lane-strided pl.ds) to avoid that extra HBM pass.
    xs = x if stride == 1 else x[:, :, ::stride][:, :, :H0]
    w3 = weight.reshape(O, C, H0)

    # Tiling: several batch rows per grid step (amortizes ~0.35us/step overhead
    # and the resident-weight reuse); optional O tiling adds a second parallel
    # axis (keeps both v7x TensorCores busy, bounds the resident weight block).
    TN = max(1, min(batch_tile, N))
    if out_tile is None or out_tile >= O:
        TO = O
    else:
        if out_tile % 8 != 0:
            raise ValueError("out_tile must be a multiple of 8 (sublane tiling rule)")
        TO = out_tile
    n_tiles = pl.cdiv(N, TN)
    o_tiles = pl.cdiv(O, TO)

    # TODO(synk): when H0 is far below 128 a fully lane-dense output (e.g. an
    # (N, O*H0) slab) would avoid masked partial stores, but it needs either an
    # in-kernel relayout or extra HBM transposes; kept the natural (N, O, H0)
    # layout since the kernel is HBM-bound.

    has_bias = bias is not None
    b2 = bias.reshape(O, H0) if has_bias else None
    operands = (xs, w3, b2) if has_bias else (xs, w3)

    itemsize = jnp.dtype(x.dtype).itemsize

    def _vmem_limit(w_bufs):
        # x/out double-buffered, weight/bias single- or double-buffered, plus
        # the f32 accumulator; re-derived per call so larger tiles are not
        # rejected by the default scoped limit, with headroom for v7x (64 MiB).
        need = itemsize * (2 * TN * C * H0 + 2 * TN * TO * H0
                           + w_bufs * (TO * C * H0 + (TO * H0 if has_bias else 0)))
        need += 4 * TN * TO * H0
        return int(min(max(2 * need + (8 << 20), 32 << 20), 48 << 20))

    flops = 2 * N * O * C * H0 + (N * O * H0 if has_bias else 0)
    bytes_accessed = int(itemsize * (xs.size + w3.size + N * O * H0
                                     + (O * H0 if has_bias else 0)))

    def _build(single_buffer_invariant):
        # Weight/bias blocks are grid-invariant when there is a single O tile:
        # single-buffer them to halve their VMEM footprint (matters on v7x).
        invariant = (pl.Buffered(1)
                     if (single_buffer_invariant and o_tiles == 1) else None)
        x_spec = pl.BlockSpec((TN, C, H0), lambda n, o: (n, 0, 0))
        w_spec = pl.BlockSpec((TO, C, H0), lambda n, o: (o, 0, 0),
                              pipeline_mode=invariant)
        o_spec = pl.BlockSpec((TN, TO, H0), lambda n, o: (n, o, 0))
        if has_bias:
            b_spec = pl.BlockSpec((TO, H0), lambda n, o: (o, 0),
                                  pipeline_mode=invariant)
            in_specs = [x_spec, w_spec, b_spec]
            kernel = _lc2d_kernel_bias
        else:
            in_specs = [x_spec, w_spec]      # no zero-bias stream when bias is None
            kernel = _lc2d_kernel_nobias
        w_bufs = 1 if invariant is not None else 2
        return pl.pallas_call(
            kernel,
            out_shape=jax.ShapeDtypeStruct((N, O, H0), x.dtype),
            grid_spec=pltpu.PrefetchScalarGridSpec(
                num_scalar_prefetch=0,
                grid=(n_tiles, o_tiles),
                in_specs=in_specs,
                out_specs=o_spec,
            ),
            compiler_params=pltpu.CompilerParams(
                dimension_semantics=("parallel", "parallel"),
                vmem_limit_bytes=_vmem_limit(w_bufs),
            ),
            cost_estimate=pl.CostEstimate(
                flops=flops, transcendentals=0, bytes_accessed=bytes_accessed),
        )

    try:
        out = jax.block_until_ready(_build(True)(*operands))
    except Exception:
        # Fallback for Pallas versions that reject single-buffered
        # (pipeline_mode=pl.Buffered(1)) invariant operands.
        out = jax.block_until_ready(_build(False)(*operands))
    return out


def reference(x, weight, bias=None, kernel_size=1, stride=1):
    """Pure-JAX re-implementation of the torch forward (kernel_size == 1)."""
    H0 = weight.shape[3]
    xs = x[:, :, ::stride][:, :, :H0]               # double unfold with k == 1
    xs = xs[:, None, :, :, None, None]              # (N, 1, C, L, 1, 1)
    out = jnp.sum(xs * weight, axis=(2, -1))        # (N, O, L, 1)
    if bias is not None:
        out = out + bias
    return jnp.squeeze(out, axis=3)                 # (N, O, L)


if __name__ == "__main__":
    key = jax.random.PRNGKey(0)

    # Config (a): with bias, stride 1 (single grid step, Buffered(1) path).
    N, C, O, H = 2, 4, 8, 16
    k, s = 1, 1
    H0 = (H - k) // s + 1
    kx, kw, kb, key = jax.random.split(key, 4)
    x = jax.random.normal(kx, (N, C, H), dtype=jnp.float32)
    w = jax.random.normal(kw, (1, O, C, H0, 1, k * k), dtype=jnp.float32)
    b = jax.random.normal(kb, (1, O, H0, 1), dtype=jnp.float32)

    out_a = locally_connected_2d(x, w, b, k, s)
    ref_a = reference(x, w, b, k, s)
    assert out_a.shape == (N, O, H0), out_a.shape
    assert jnp.allclose(out_a, ref_a, atol=1e-5, rtol=1e-5)

    # Config (a-bf16): same problem with bf16 inputs (f32 accumulation inside).
    out_bf = locally_connected_2d(x.astype(jnp.bfloat16),
                                  w.astype(jnp.bfloat16),
                                  b.astype(jnp.bfloat16), k, s)
    assert jnp.allclose(out_bf.astype(jnp.float32), ref_a, atol=1e-1, rtol=1e-1)

    # Config (b): no bias (module default), stride 2, batched N tiles and a
    # second parallel grid axis over O tiles (keeps both v7x TCs busy).
    N, C, O, H = 16, 8, 16, 32
    k, s = 1, 2
    H0 = (H - k) // s + 1
    kx, kw, key = jax.random.split(key, 3)
    x = jax.random.normal(kx, (N, C, H), dtype=jnp.float32)
    w = jax.random.normal(kw, (1, O, C, H0, 1, k * k), dtype=jnp.float32)

    out_b = locally_connected_2d(x, w, None, k, s, batch_tile=8, out_tile=8)
    ref_b = reference(x, w, None, k, s)
    assert out_b.shape == (N, O, H0), out_b.shape
    assert jnp.allclose(out_b, ref_b, atol=1e-5, rtol=1e-5)

    print("KERNEL_OK")
</pallas_src>

<mosaic_0001>
module attributes {stable_mosaic.version = 11 : i64} {
  func.func @_lc2d_kernel_bias(%arg0: i32, %arg1: i32, %arg2: memref<2x4x16xf32, #tpu.memory_space<vmem>>, %arg3: memref<8x4x16xf32, #tpu.memory_space<vmem>>, %arg4: memref<8x16xf32, #tpu.memory_space<vmem>>, %arg5: memref<2x8x16xf32, #tpu.memory_space<vmem>>) attributes {dimension_semantics = [#tpu.dimension_semantics<parallel>, #tpu.dimension_semantics<parallel>], iteration_bounds = array<i64: 1, 1>, scalar_prefetch = 0 : i64, scratch_operands = 0 : i64, tpu.core_type = #tpu.core_type<tc>, window_params = [{transform_indices = @transform_0, window_bounds = array<i64: 2, 4, 16>}, {pipeline_mode = #tpu.pipeline_mode<synchronous>, transform_indices = @transform_1, window_bounds = array<i64: 8, 4, 16>}, {pipeline_mode = #tpu.pipeline_mode<synchronous>, transform_indices = @transform_2, window_bounds = array<i64: 8, 16>}, {transform_indices = @transform_3, window_bounds = array<i64: 2, 8, 16>}]} {
    %c0 = arith.constant 0 : index
    %c0_0 = arith.constant 0 : index
    %0 = vector.load %arg4[%c0, %c0_0] : memref<8x16xf32, #tpu.memory_space<vmem>>, vector<8x16xf32>
    %1 = vector.shape_cast %0 : vector<8x16xf32> to vector<1x8x16xf32>
    %2 = vector.shape_cast %1 : vector<1x8x16xf32> to vector<1x8x16xf32>
    %3 = vector.broadcast %2 : vector<1x8x16xf32> to vector<2x8x16xf32>
    %c0_1 = arith.constant 0 : index
    %c0_2 = arith.constant 0 : index
    %c0_3 = arith.constant 0 : index
    %4 = vector.load %arg2[%c0_1, %c0_2, %c0_3] : memref<2x4x16xf32, #tpu.memory_space<vmem>>, vector<2x1x16xf32>
    %5 = vector.shape_cast %4 : vector<2x1x16xf32> to vector<2x16xf32>
    %c0_4 = arith.constant 0 : index
    %c0_5 = arith.constant 0 : index
    %c0_6 = arith.constant 0 : index
    %6 = vector.load %arg3[%c0_4, %c0_5, %c0_6] : memref<8x4x16xf32, #tpu.memory_space<vmem>>, vector<8x1x16xf32>
    %7 = vector.shape_cast %6 : vector<8x1x16xf32> to vector<8x16xf32>
    %8 = vector.shape_cast %5 : vector<2x16xf32> to vector<2x1x16xf32>
    %9 = vector.shape_cast %7 : vector<8x16xf32> to vector<1x8x16xf32>
    %10 = vector.broadcast %8 : vector<2x1x16xf32> to vector<2x8x16xf32>
    %11 = vector.broadcast %9 : vector<1x8x16xf32> to vector<2x8x16xf32>
    %12 = arith.mulf %10, %11 : vector<2x8x16xf32>
    %13 = arith.addf %3, %12 : vector<2x8x16xf32>
    %c0_7 = arith.constant 0 : index
    %c1 = arith.constant 1 : index
    %c0_8 = arith.constant 0 : index
    %14 = vector.load %arg2[%c0_7, %c1, %c0_8] : memref<2x4x16xf32, #tpu.memory_space<vmem>>, vector<2x1x16xf32>
    %15 = vector.shape_cast %14 : vector<2x1x16xf32> to vector<2x16xf32>
    %c0_9 = arith.constant 0 : index
    %c1_10 = arith.constant 1 : index
    %c0_11 = arith.constant 0 : index
    %16 = vector.load %arg3[%c0_9, %c1_10, %c0_11] : memref<8x4x16xf32, #tpu.memory_space<vmem>>, vector<8x1x16xf32>
    %17 = vector.shape_cast %16 : vector<8x1x16xf32> to vector<8x16xf32>
    %18 = vector.shape_cast %15 : vector<2x16xf32> to vector<2x1x16xf32>
    %19 = vector.shape_cast %17 : vector<8x16xf32> to vector<1x8x16xf32>
    %20 = vector.broadcast %18 : vector<2x1x16xf32> to vector<2x8x16xf32>
    %21 = vector.broadcast %19 : vector<1x8x16xf32> to vector<2x8x16xf32>
    %22 = arith.mulf %20, %21 : vector<2x8x16xf32>
    %23 = arith.addf %13, %22 : vector<2x8x16xf32>
    %c0_12 = arith.constant 0 : index
    %c2 = arith.constant 2 : index
    %c0_13 = arith.constant 0 : index
    %24 = vector.load %arg2[%c0_12, %c2, %c0_13] : memref<2x4x16xf32, #tpu.memory_space<vmem>>, vector<2x1x16xf32>
    %25 = vector.shape_cast %24 : vector<2x1x16xf32> to vector<2x16xf32>
    %c0_14 = arith.constant 0 : index
    %c2_15 = arith.constant 2 : index
    %c0_16 = arith.constant 0 : index
    %26 = vector.load %arg3[%c0_14, %c2_15, %c0_16] : memref<8x4x16xf32, #tpu.memory_space<vmem>>, vector<8x1x16xf32>
    %27 = vector.shape_cast %26 : vector<8x1x16xf32> to vector<8x16xf32>
    %28 = vector.shape_cast %25 : vector<2x16xf32> to vector<2x1x16xf32>
    %29 = vector.shape_cast %27 : vector<8x16xf32> to vector<1x8x16xf32>
    %30 = vector.broadcast %28 : vector<2x1x16xf32> to vector<2x8x16xf32>
    %31 = vector.broadcast %29 : vector<1x8x16xf32> to vector<2x8x16xf32>
    %32 = arith.mulf %30, %31 : vector<2x8x16xf32>
    %33 = arith.addf %23, %32 : vector<2x8x16xf32>
    %c0_17 = arith.constant 0 : index
    %c3 = arith.constant 3 : index
    %c0_18 = arith.constant 0 : index
    %34 = vector.load %arg2[%c0_17, %c3, %c0_18] : memref<2x4x16xf32, #tpu.memory_space<vmem>>, vector<2x1x16xf32>
    %35 = vector.shape_cast %34 : vector<2x1x16xf32> to vector<2x16xf32>
    %c0_19 = arith.constant 0 : index
    %c3_20 = arith.constant 3 : index
    %c0_21 = arith.constant 0 : index
    %36 = vector.load %arg3[%c0_19, %c3_20, %c0_21] : memref<8x4x16xf32, #tpu.memory_space<vmem>>, vector<8x1x16xf32>
    %37 = vector.shape_cast %36 : vector<8x1x16xf32> to vector<8x16xf32>
    %38 = vector.shape_cast %35 : vector<2x16xf32> to vector<2x1x16xf32>
    %39 = vector.shape_cast %37 : vector<8x16xf32> to vector<1x8x16xf32>
    %40 = vector.broadcast %38 : vector<2x1x16xf32> to vector<2x8x16xf32>
    %41 = vector.broadcast %39 : vector<1x8x16xf32> to vector<2x8x16xf32>
    %42 = arith.mulf %40, %41 : vector<2x8x16xf32>
    %43 = arith.addf %33, %42 : vector<2x8x16xf32>
    %c0_22 = arith.constant 0 : index
    %c0_23 = arith.constant 0 : index
    %c0_24 = arith.constant 0 : index
    %44 = vector.load %arg5[%c0_22, %c0_23, %c0_24] : memref<2x8x16xf32, #tpu.memory_space<vmem>>, vector<2x8x16xf32>
    tpu.vector_store %arg5[%c0_22, %c0_23, %c0_24], %43 {strides = array<i32>} : memref<2x8x16xf32, #tpu.memory_space<vmem>>, vector<2x8x16xf32>,
    return
  }
  func.func @transform_0(%arg0: i32, %arg1: i32) -> (i32, i32, i32) {
    %c0_i32 = arith.constant 0 : i32
    %c0_i32_0 = arith.constant 0 : i32
    %c0_i32_1 = arith.constant 0 : i32
    return %arg0, %c0_i32, %c0_i32_0 : i32, i32, i32
  }
  func.func @transform_1(%arg0: i32, %arg1: i32) -> (i32, i32, i32) {
    %c0_i32 = arith.constant 0 : i32
    %c0_i32_0 = arith.constant 0 : i32
    %c0_i32_1 = arith.constant 0 : i32
    return %arg1, %c0_i32, %c0_i32_0 : i32, i32, i32
  }
  func.func @transform_2(%arg0: i32, %arg1: i32) -> (i32, i32) {
    %c0_i32 = arith.constant 0 : i32
    %c0_i32_0 = arith.constant 0 : i32
    return %arg1, %c0_i32 : i32, i32
  }
  func.func @transform_3(%arg0: i32, %arg1: i32) -> (i32, i32, i32) {
    %c0_i32 = arith.constant 0 : i32
    %c0_i32_0 = arith.constant 0 : i32
    return %arg0, %arg1, %c0_i32 : i32, i32, i32
  }
}

module attributes {stable_mosaic.version = 11 : i64} {
  func.func @_lc2d_kernel_bias(%arg0: i32, %arg1: i32, %arg2: memref<2x4x16xf32, #tpu.memory_space<vmem>>, %arg3: memref<8x4x16xf32, #tpu.memory_space<vmem>>, %arg4: memref<8x16xf32, #tpu.memory_space<vmem>>, %arg5: memref<2x8x16xf32, #tpu.memory_space<vmem>>) attributes {dimension_semantics = [#tpu.dimension_semantics<parallel>, #tpu.dimension_semantics<parallel>], iteration_bounds = array<i64: 1, 1>, scalar_prefetch = 0 : i64, scratch_operands = 0 : i64, tpu.core_type = #tpu.core_type<tc>, window_params = [{transform_indices = @transform_0, window_bounds = array<i64: 2, 4, 16>}, {transform_indices = @transform_1, window_bounds = array<i64: 8, 4, 16>}, {transform_indices = @transform_2, window_bounds = array<i64: 8, 16>}, {transform_indices = @transform_3, window_bounds = array<i64: 2, 8, 16>}]} {
    %c0 = arith.constant 0 : index
    %c0_0 = arith.constant 0 : index
    %0 = vector.load %arg4[%c0, %c0_0] : memref<8x16xf32, #tpu.memory_space<vmem>>, vector<8x16xf32>
    %1 = vector.shape_cast %0 : vector<8x16xf32> to vector<1x8x16xf32>
    %2 = vector.shape_cast %1 : vector<1x8x16xf32> to vector<1x8x16xf32>
    %3 = vector.broadcast %2 : vector<1x8x16xf32> to vector<2x8x16xf32>
    %c0_1 = arith.constant 0 : index
    %c0_2 = arith.constant 0 : index
    %c0_3 = arith.constant 0 : index
    %4 = vector.load %arg2[%c0_1, %c0_2, %c0_3] : memref<2x4x16xf32, #tpu.memory_space<vmem>>, vector<2x1x16xf32>
    %5 = vector.shape_cast %4 : vector<2x1x16xf32> to vector<2x16xf32>
    %c0_4 = arith.constant 0 : index
    %c0_5 = arith.constant 0 : index
    %c0_6 = arith.constant 0 : index
    %6 = vector.load %arg3[%c0_4, %c0_5, %c0_6] : memref<8x4x16xf32, #tpu.memory_space<vmem>>, vector<8x1x16xf32>
    %7 = vector.shape_cast %6 : vector<8x1x16xf32> to vector<8x16xf32>
    %8 = vector.shape_cast %5 : vector<2x16xf32> to vector<2x1x16xf32>
    %9 = vector.shape_cast %7 : vector<8x16xf32> to vector<1x8x16xf32>
    %10 = vector.broadcast %8 : vector<2x1x16xf32> to vector<2x8x16xf32>
    %11 = vector.broadcast %9 : vector<1x8x16xf32> to vector<2x8x16xf32>
    %12 = arith.mulf %10, %11 : vector<2x8x16xf32>
    %13 = arith.addf %3, %12 : vector<2x8x16xf32>
    %c0_7 = arith.constant 0 : index
    %c1 = arith.constant 1 : index
    %c0_8 = arith.constant 0 : index
    %14 = vector.load %arg2[%c0_7, %c1, %c0_8] : memref<2x4x16xf32, #tpu.memory_space<vmem>>, vector<2x1x16xf32>
    %15 = vector.shape_cast %14 : vector<2x1x16xf32> to vector<2x16xf32>
    %c0_9 = arith.constant 0 : index
    %c1_10 = arith.constant 1 : index
    %c0_11 = arith.constant 0 : index
    %16 = vector.load %arg3[%c0_9, %c1_10, %c0_11] : memref<8x4x16xf32, #tpu.memory_space<vmem>>, vector<8x1x16xf32>
    %17 = vector.shape_cast %16 : vector<8x1x16xf32> to vector<8x16xf32>
    %18 = vector.shape_cast %15 : vector<2x16xf32> to vector<2x1x16xf32>
    %19 = vector.shape_cast %17 : vector<8x16xf32> to vector<1x8x16xf32>
    %20 = vector.broadcast %18 : vector<2x1x16xf32> to vector<2x8x16xf32>
    %21 = vector.broadcast %19 : vector<1x8x16xf32> to vector<2x8x16xf32>
    %22 = arith.mulf %20, %21 : vector<2x8x16xf32>
    %23 = arith.addf %13, %22 : vector<2x8x16xf32>
    %c0_12 = arith.constant 0 : index
    %c2 = arith.constant 2 : index
    %c0_13 = arith.constant 0 : index
    %24 = vector.load %arg2[%c0_12, %c2, %c0_13] : memref<2x4x16xf32, #tpu.memory_space<vmem>>, vector<2x1x16xf32>
    %25 = vector.shape_cast %24 : vector<2x1x16xf32> to vector<2x16xf32>
    %c0_14 = arith.constant 0 : index
    %c2_15 = arith.constant 2 : index
    %c0_16 = arith.constant 0 : index
    %26 = vector.load %arg3[%c0_14, %c2_15, %c0_16] : memref<8x4x16xf32, #tpu.memory_space<vmem>>, vector<8x1x16xf32>
    %27 = vector.shape_cast %26 : vector<8x1x16xf32> to vector<8x16xf32>
    %28 = vector.shape_cast %25 : vector<2x16xf32> to vector<2x1x16xf32>
    %29 = vector.shape_cast %27 : vector<8x16xf32> to vector<1x8x16xf32>
    %30 = vector.broadcast %28 : vector<2x1x16xf32> to vector<2x8x16xf32>
    %31 = vector.broadcast %29 : vector<1x8x16xf32> to vector<2x8x16xf32>
    %32 = arith.mulf %30, %31 : vector<2x8x16xf32>
    %33 = arith.addf %23, %32 : vector<2x8x16xf32>
    %c0_17 = arith.constant 0 : index
    %c3 = arith.constant 3 : index
    %c0_18 = arith.constant 0 : index
    %34 = vector.load %arg2[%c0_17, %c3, %c0_18] : memref<2x4x16xf32, #tpu.memory_space<vmem>>, vector<2x1x16xf32>
    %35 = vector.shape_cast %34 : vector<2x1x16xf32> to vector<2x16xf32>
    %c0_19 = arith.constant 0 : index
    %c3_20 = arith.constant 3 : index
    %c0_21 = arith.constant 0 : index
    %36 = vector.load %arg3[%c0_19, %c3_20, %c0_21] : memref<8x4x16xf32, #tpu.memory_space<vmem>>, vector<8x1x16xf32>
    %37 = vector.shape_cast %36 : vector<8x1x16xf32> to vector<8x16xf32>
    %38 = vector.shape_cast %35 : vector<2x16xf32> to vector<2x1x16xf32>
    %39 = vector.shape_cast %37 : vector<8x16xf32> to vector<1x8x16xf32>
    %40 = vector.broadcast %38 : vector<2x1x16xf32> to vector<2x8x16xf32>
    %41 = vector.broadcast %39 : vector<1x8x16xf32> to vector<2x8x16xf32>
    %42 = arith.mulf %40, %41 : vector<2x8x16xf32>
    %43 = arith.addf %33, %42 : vector<2x8x16xf32>
    %c0_22 = arith.constant 0 : index
    %c0_23 = arith.constant 0 : index
    %c0_24 = arith.constant 0 : index
    %44 = vector.load %arg5[%c0_22, %c0_23, %c0_24] : memref<2x8x16xf32, #tpu.memory_space<vmem>>, vector<2x8x16xf32>
    tpu.vector_store %arg5[%c0_22, %c0_23, %c0_24], %43 {strides = array<i32>} : memref<2x8x16xf32, #tpu.memory_space<vmem>>, vector<2x8x16xf32>,
    return
  }
  func.func @transform_0(%arg0: i32, %arg1: i32) -> (i32, i32, i32) {
    %c0_i32 = arith.constant 0 : i32
    %c0_i32_0 = arith.constant 0 : i32
    %c0_i32_1 = arith.constant 0 : i32
    return %arg0, %c0_i32, %c0_i32_0 : i32, i32, i32
  }
  func.func @transform_1(%arg0: i32, %arg1: i32) -> (i32, i32, i32) {
    %c0_i32 = arith.constant 0 : i32
    %c0_i32_0 = arith.constant 0 : i32
    %c0_i32_1 = arith.constant 0 : i32
    return %arg1, %c0_i32, %c0_i32_0 : i32, i32, i32
  }
  func.func @transform_2(%arg0: i32, %arg1: i32) -> (i32, i32) {
    %c0_i32 = arith.constant 0 : i32
    %c0_i32_0 = arith.constant 0 : i32
    return %arg1, %c0_i32 : i32, i32
  }
  func.func @transform_3(%arg0: i32, %arg1: i32) -> (i32, i32, i32) {
    %c0_i32 = arith.constant 0 : i32
    %c0_i32_0 = arith.constant 0 : i32
    return %arg0, %arg1, %c0_i32 : i32, i32, i32
  }
}

</mosaic_0001>

<bundles_post_ra>
// kernel: tpu_custom_call.1
= control target key start
LH: loop header
LB: loop body
LE: loop exit
PB: predicated region body
PF: predicated region fallthrough
CT: control target
= control target key end

     0   :  { %8 = vsyncpa [#allocation3], 0  ;;  %s488_s0 = inlined_call_operand.hbm [shape: f32[2,4,16], index: 0, kind: input, shape index: {}]   ;;  %s489_s1 = inlined_call_operand.hbm [shape: f32[8,4,16], index: 1, kind: input, shape index: {}]   ;;  %s490_s2 = inlined_call_operand.hbm [shape: f32[8,16], index: 2, kind: input, shape index: {}]   ;;  %s491_s3 = inlined_call_operand.hbm [shape: f32[2,8,16], index: 3, kind: output, shape index: {}]  }
   0x1   :  { %9 = vsyncpa [#allocation6], 0 }
   0x2   :  { %10 = vsyncpa [#allocation4], 0  ;;  %s373_s12 = smov [#allocation5]   ;;  %s374_s14 = smov [#allocation2]  }
   0x3   :  { %s28_s13 = sshll.u32 %s373_s12, 4  ;;  %s16_s15 = sshll.u32 %s374_s14, 4  ;;  %s29_s13 = int_to_ptr.vmem [resolvable:$true] %s28_s13  ;;  %s401_s15 = int_to_ptr.vmem [resolvable:$true] %s16_s15 }
   0x4   :  { %s279_s18 = scalar_lea.hbm %s489_s1, 512 }
   0x5   :  { %p280_p0 = scmp.ne.s32.totalorder %s489_s1, %s279_s18  ;;  %p283_p1 = scmp.lt.u32.totalorder %s279_s18, %s489_s1 }
   0x7   :  { %p285_p2 = pnand %p283_p1, %p280_p0 }
   0x9   :  { %288 = shalt.err (!%p285_p2)
}
   0xa   :  { %s289_s23 = scalar_lea.vmem %s29_s13, 512  ;;  %p294_p4 = scmp.lt.s32.totalorder %s29_s13, %s29_s13 }
   0xb   :  { %p290_p3 = scmp.ne.s32.totalorder %s29_s13, %s289_s23  ;;  %p295_p5 = scmp.lt.s32.totalorder %s289_s23, %s289_s23 }
   0xd   :  { %p296_p6 = por %p295_p5, %p294_p4 }
   0xf   :  { %p297_p7 = pnand %p296_p6, %p290_p3 }
  0x11   :  { %300 = shalt.err (!%p297_p7)
}
  0x12   :  { %s375_s24 = smov 64   ;;  %s376_s25 = smov 4  }
  0x13   :  { %34 = dma.hbm_to_vmem [thread:$0]  %s489_s1, 512, %s29_s13, [#allocation6], %s375_s24, %s375_s24, %s376_s25  }
  0x14   :  { %s301_s30 = scalar_lea.hbm %s488_s0, 128 }
  0x15   :  { %p302_p8 = scmp.ne.s32.totalorder %s488_s0, %s301_s30  ;;  %p305_p9 = scmp.lt.u32.totalorder %s301_s30, %s488_s0 }
  0x17   :  { %p307_p10 = pnand %p305_p9, %p302_p8 }
  0x19   :  { %310 = shalt.err (!%p307_p10)
}
  0x1a   :  { %s311_s8 = scalar_lea.vmem %s401_s15, 128  ;;  %p316_p12 = scmp.lt.s32.totalorder %s401_s15, %s401_s15 }
  0x1b   :  { %p312_p11 = scmp.ne.s32.totalorder %s401_s15, %s311_s8  ;;  %p317_p13 = scmp.lt.s32.totalorder %s311_s8, %s311_s8 }
  0x1d   :  { %p318_p0 = por %p317_p13, %p316_p12 }
  0x1f   :  { %p319_p1 = pnand %p318_p0, %p312_p11 }
  0x21   :  { %322 = shalt.err (!%p319_p1)
}
  0x22   :  { %22 = dma.hbm_to_vmem [thread:$0]  %s488_s0, 128, %s401_s15, [#allocation3], %s375_s24, %s375_s24, %s376_s25  }
  0x23   :  { %s377_s10 = smov [#allocation7]   ;;  %s323_s14 = scalar_lea.hbm %s490_s2, 128 }
  0x24   :  { %s41_s11 = sshll.u32 %s377_s10, 4  ;;  %p324_p2 = scmp.ne.s32.totalorder %s490_s2, %s323_s14  ;;  %s42_s11 = int_to_ptr.vmem [resolvable:$true] %s41_s11 }
  0x25   :  { %p327_p3 = scmp.lt.u32.totalorder %s323_s14, %s490_s2 }
  0x27   :  { %p329_p4 = pnand %p327_p3, %p324_p2 }
  0x29   :  { %332 = shalt.err (!%p329_p4)
}
  0x2a   :  { %s333_s20 = scalar_lea.vmem %s42_s11, 128  ;;  %p338_p6 = scmp.lt.s32.totalorder %s42_s11, %s42_s11 }
  0x2b   :  { %p334_p5 = scmp.ne.s32.totalorder %s42_s11, %s333_s20  ;;  %p339_p7 = scmp.lt.s32.totalorder %s333_s20, %s333_s20 }
  0x2d   :  { %p340_p8 = por %p339_p7, %p338_p6 }
  0x2f   :  { %p341_p9 = pnand %p340_p8, %p334_p5 }
  0x31   :  { %344 = shalt.err (!%p341_p9)
}
  0x32   :  { %44 = dma.hbm_to_vmem [thread:$0]  %s490_s2, 128, %s42_s11, [#allocation6]  }
  0x33   :  { %367 = dma.done.wait [#allocation3], 128  }
  0x34   :  { %368 = vsyncadd [#allocation3], 4294967168 }
  0x35   :  { %369 = dma.done.wait [#allocation6], 640  }
  0x36   :  { %370 = vsyncadd [#allocation6], 4294966656  ;;  %vm82_vm0 = vcmask 1041409   ;;  %vm85_vm1 = vcmask 1042434   ;;  %v57_v0 = vld [vmem:[#allocation5] sm:$0x1] }
  0x37   :  { %vm88_vm2 = vcmask 1043459   ;;  %vm91_vm3 = vcmask 1044484   ;;  %vm94_vm4 = vcmask 1045509   ;;  %vm97_vm5 = vcmask 1046534   ;;  %v58_v1 = vld [vmem:[#allocation5 + $0x4] sm:$0x1] }
  0x38   :  { %v59_v2 = vld [vmem:[#allocation5 + $0x8] sm:$0x1]  ;;  %v60_v3 = vld [vmem:[#allocation5 + $0xc] sm:$0x1]  ;;  %v61_v4 = vld [vmem:[#allocation5 + $0x10] sm:$0x1] }
  0x39   :  { %v62_v5 = vld [vmem:[#allocation5 + $0x14] sm:$0x1]  ;;  %v63_v6 = vld [vmem:[#allocation5 + $0x18] sm:$0x1]  ;;  %v64_v7 = vld [vmem:[#allocation5 + $0x1c] sm:$0x1] }
  0x3a   :  { %v81_v8 = vrot.slane %v58_v1, 7  ;;  %v84_v9 = vrot.slane %v59_v2, 6  ;;  %v87_v10 = vrot.slane %v60_v3, 5  ;;  %vm100_vm6 = vcmask 1047559   ;;  %v109_v16 = vld [vmem:[#allocation5 + $0x1] sm:$0x1] }
  0x3b   :  { %v90_v11 = vrot.slane %v61_v4, 4  ;;  %v93_v12 = vrot.slane %v62_v5, 3  ;;  %v96_v13 = vrot.slane %v63_v6, 2  ;;  %v99_v14 = vrot.slane %v64_v7, 1  ;;  %v110_v17 = vld [vmem:[#allocation5 + $0x5] sm:$0x1] }
  0x3c   :  { %v83_v15 = vsel %vm82_vm0, %v81_v8, %v57_v0  ;;  %v111_v18 = vld [vmem:[#allocation5 + $0x9] sm:$0x1]  ;;  %v112_v20 = vld [vmem:[#allocation5 + $0xd] sm:$0x1]  ;;  %v113_v21 = vld [vmem:[#allocation5 + $0x11] sm:$0x1] }
  0x3d   :  { %v86_v19 = vsel %vm85_vm1, %v84_v9, %v83_v15  ;;  %v114_v22 = vld [vmem:[#allocation5 + $0x15] sm:$0x1]  ;;  %v115_v24 = vld [vmem:[#allocation5 + $0x19] sm:$0x1]  ;;  %v116_v25 = vld [vmem:[#allocation5 + $0x1d] sm:$0x1] }
  0x3e   :  { %v89_v23 = vsel %vm88_vm2, %v87_v10, %v86_v19  ;;  %v133_v26 = vrot.slane %v110_v17, 7  ;;  %v135_v27 = vrot.slane %v111_v18, 6  ;;  %v137_v29 = vrot.slane %v112_v20, 5  ;;  %v448_v32 = vld [vmem:[#allocation7] sm:$0xff]  ;;  %v263_v33 = vld [vmem:[#allocation2] ss:$0 sm:$0xff] }
  0x3f   :  { %v92_v28 = vsel %vm91_vm3, %v90_v11, %v89_v23  ;;  %v139_v30 = vrot.slane %v113_v21, 4  ;;  %v141_v31 = vrot.slane %v114_v22, 3  ;;  %v143_v36 = vrot.slane %v115_v24, 2  ;;  %v155_v38 = vld [vmem:[#allocation5 + $0x6] sm:$0x1]  ;;  %s378_s2 = smov [#allocation8]  }
  0x40   :  { %v95_v34 = vsel %vm94_vm4, %v93_v12, %v92_v28  ;;  %v134_v35 = vsel %vm82_vm0, %v133_v26, %v109_v16  ;;  %v145_v37 = vrot.slane %v116_v25, 1  ;;  %v156_v41 = vld [vmem:[#allocation5 + $0xa] sm:$0x1]  ;;  %v157_v42 = vld [vmem:[#allocation5 + $0xe] sm:$0x1]  ;;  %v178_v53 = vrot.slane %v155_v38, 7 }
  0x41   :  { %v98_v39 = vsel %vm97_vm5, %v96_v13, %v95_v34  ;;  %v136_v40 = vsel %vm85_vm1, %v135_v27, %v134_v35  ;;  %v158_v43 = vld [vmem:[#allocation5 + $0x12] sm:$0x1]  ;;  %v265_v45 = vld [vmem:[#allocation2 + $0x1] ss:$0 sm:$0xff]  ;;  %v154_v47 = vld [vmem:[#allocation5 + $0x2] sm:$0x1] }
  0x42   :  { %v101_v44 = vsel %vm100_vm6, %v99_v14, %v98_v39  ;;  %v138_v46 = vsel %vm88_vm2, %v137_v29, %v136_v40  ;;  %v159_v48 = vld [vmem:[#allocation5 + $0x16] sm:$0x1]  ;;  %v160_v49 = vld [vmem:[#allocation5 + $0x1a] sm:$0x1]  ;;  %v161_v52 = vld [vmem:[#allocation5 + $0x1e] sm:$0x1]  ;;  %v179_v63 = vsel %vm82_vm0, %v178_v53, %v154_v47 }
  0x43   :  { %v103_v50 = vmul.f32 %v263_v33, %v101_v44  ;;  %v140_v51 = vsel %vm91_vm3, %v139_v30, %v138_v46  ;;  %v180_v54 = vrot.slane %v156_v41, 6  ;;  %v199_v55 = vld [vmem:[#allocation5 + $0x3] sm:$0x1]  ;;  %v182_v57 = vrot.slane %v157_v42, 5  ;;  %v200_v60 = vld [vmem:[#allocation5 + $0x7] sm:$0x1] }
  0x44   :  { %v142_v56 = vsel %vm94_vm4, %v141_v31, %v140_v51  ;;  %v184_v58 = vrot.slane %v158_v43, 4  ;;  %v186_v59 = vrot.slane %v159_v48, 3  ;;  %v188_v0 = vrot.slane %v160_v49, 2  ;;  %v201_v1 = vld [vmem:[#allocation5 + $0xb] sm:$0x1]  ;;  %s250_s21 = sshll.u32 %s378_s2, 4  ;;  %s251_s21 = int_to_ptr.vmem [resolvable:$true] %s250_s21 }
  0x45   :  { %v105_v61 = vadd.f32 %v103_v50, %v448_v32  ;;  %v144_v62 = vsel %vm97_vm5, %v143_v36, %v142_v56  ;;  %v202_v2 = vld [vmem:[#allocation5 + $0xf] sm:$0x1]  ;;  %v181_v4 = vsel %vm85_vm1, %v180_v54, %v179_v63  ;;  %v190_v5 = vrot.slane %v161_v52, 1  ;;  %v203_v6 = vld [vmem:[#allocation5 + $0x13] sm:$0x1]  ;;  %s345_s22 = scalar_lea.vmem %s251_s21, 256  ;;  %p350_p11 = scmp.lt.s32.totalorder %s251_s21, %s251_s21 }
  0x46   :  { %v146_v3 = vsel %vm100_vm6, %v145_v37, %v144_v62  ;;  %v204_v7 = vld [vmem:[#allocation5 + $0x17] sm:$0x1]  ;;  %v223_v8 = vrot.slane %v200_v60, 7  ;;  %v183_v10 = vsel %vm88_vm2, %v182_v57, %v181_v4  ;;  %v205_v11 = vld [vmem:[#allocation5 + $0x1b] sm:$0x1]  ;;  %v225_v13 = vrot.slane %v201_v1, 6  ;;  %p346_p10 = scmp.ne.s32.totalorder %s251_s21, %s345_s22  ;;  %p351_p12 = scmp.lt.s32.totalorder %s345_s22, %s345_s22 }
  0x47   :  { %v148_v9 = vmul.f32 %v265_v45, %v146_v3  ;;  %v206_v12 = vld [vmem:[#allocation5 + $0x1f] sm:$0x1]  ;;  %v227_v14 = vrot.slane %v202_v2, 5  ;;  %v185_v15 = vsel %vm91_vm3, %v184_v58, %v183_v10  ;;  %v229_v17 = vrot.slane %v203_v6, 4  ;;  %v264_v19 = vld [vmem:[#allocation2 + $0x4] ss:$0 sm:$0xff] }
  0x48   :  { %v224_v16 = vsel %vm82_vm0, %v223_v8, %v199_v55  ;;  %v231_v18 = vrot.slane %v204_v7, 3  ;;  %v266_v20 = vld [vmem:[#allocation2 + $0x5] ss:$0 sm:$0xff]  ;;  %v267_v22 = vld [vmem:[#allocation2 + $0x2] ss:$0 sm:$0xff]  ;;  %v187_v23 = vsel %vm94_vm4, %v186_v59, %v185_v15  ;;  %v233_v25 = vrot.slane %v205_v11, 2  ;;  %p352_p13 = por %p351_p12, %p350_p11 }
  0x49   :  { %v150_v21 = vadd.f32 %v148_v9, %v105_v61  ;;  %v226_v24 = vsel %vm85_vm1, %v225_v13, %v224_v16  ;;  %v268_v26 = vld [vmem:[#allocation2 + $0x6] ss:$0 sm:$0xff]  ;;  %v189_v27 = vsel %vm97_vm5, %v188_v0, %v187_v23  ;;  %v235_v29 = vrot.slane %v206_v12, 1  ;;  %v269_v36 = vld [vmem:[#allocation2 + $0x3] ss:$0 sm:$0xff] }
  0x4a   :  { %v228_v28 = vsel %vm88_vm2, %v227_v14, %v226_v24  ;;  %v104_v30 = vmul.f32 %v264_v19, %v101_v44  ;;  %v191_v31 = vsel %vm100_vm6, %v190_v5, %v189_v27  ;;  %v149_v34 = vmul.f32 %v266_v20, %v146_v3  ;;  %v270_v40 = vld [vmem:[#allocation2 + $0x7] ss:$0 sm:$0xff]  ;;  %p353_p0 = pnand %p352_p13, %p346_p10 }
  0x4b   :  { %v230_v33 = vsel %vm91_vm3, %v229_v17, %v228_v28  ;;  %v193_v35 = vmul.f32 %v267_v22, %v191_v31  ;;  %v194_v39 = vmul.f32 %v268_v26, %v191_v31  ;;  %vm242_vm7 = vcmask 130048  }
  0x4c   :  { %v232_v37 = vsel %vm94_vm4, %v231_v18, %v230_v33  ;;  %v106_v38 = vadd.f32 %v104_v30, %v448_v32 }
  0x4d   :  { %v234_v41 = vsel %vm97_vm5, %v233_v25, %v232_v37  ;;  %v195_v42 = vadd.f32 %v193_v35, %v150_v21 }
  0x4e   :  { %v236_v43 = vsel %vm100_vm6, %v235_v29, %v234_v41  ;;  %v151_v45 = vadd.f32 %v149_v34, %v106_v38 }
  0x4f   :  { %v238_v44 = vmul.f32 %v269_v36, %v236_v43  ;;  %v239_v46 = vmul.f32 %v270_v40, %v236_v43 }
  0x50   :  { %v196_v47 = vadd.f32 %v194_v39, %v151_v45 }
  0x51   :  { %v240_v48 = vadd.f32 %v238_v44, %v195_v42 }
  0x52   :  { %v241_v49 = vadd.f32 %v239_v46, %v196_v47 }
  0x53   :  { %243 = vst.msk [vmem:[#allocation8] sm:$0xff] %vm242_vm7, %v240_v48 }
  0x54   :  { %244 = vst.msk [vmem:[#allocation8 + $0x8] sm:$0xff] %vm242_vm7, %v241_v49 }
  0x55   :  { %356 = shalt.err (!%p353_p0)
}
  0x56   :  { %s357_s25 = scalar_lea.hbm %s491_s3, 256 }
  0x57   :  { %p358_p1 = scmp.ne.s32.totalorder %s491_s3, %s357_s25  ;;  %p361_p2 = scmp.lt.u32.totalorder %s357_s25, %s491_s3 }
  0x59   :  { %p363_p3 = pnand %p361_p2, %p358_p1 }
  0x5b   :  { %366 = shalt.err (!%p363_p3)
}
  0x5c   :  { %s379_s30 = smov 128   ;;  %s380_s4 = smov 8  }
  0x5d   :  { %256 = dma.vmem_to_hbm [thread:$0]  %s251_s21, 256, %s491_s3, [#allocation4], %s379_s30, %s379_s30, %s380_s4  }
  0x5e   :  { %371 = dma.done.wait [#allocation4], 256  }
  0x5f   :  { %372 = vsyncadd [#allocation4], 4294967040 }
  0x60   :  { %260 = vsyncpa [#allocation3], 1 }
  0x61   :  { %261 = vsyncpa [#allocation6], 1 }
  0x62   :  { %262 = vsyncpa [#allocation4], 1 }

// kernel: tpu_custom_call.1
= control target key start
LH: loop header
LB: loop body
LE: loop exit
PB: predicated region body
PF: predicated region fallthrough
CT: control target
= control target key end

     0   :  { %8 = vsyncpa [#allocation3], 0  ;;  %s488_s0 = inlined_call_operand.hbm [shape: f32[2,4,16], index: 0, kind: input, shape index: {}]   ;;  %s489_s1 = inlined_call_operand.hbm [shape: f32[8,4,16], index: 1, kind: input, shape index: {}]   ;;  %s490_s2 = inlined_call_operand.hbm [shape: f32[8,16], index: 2, kind: input, shape index: {}]   ;;  %s491_s3 = inlined_call_operand.hbm [shape: f32[2,8,16], index: 3, kind: output, shape index: {}]  }
   0x1   :  { %9 = vsyncpa [#allocation6], 0 }
   0x2   :  { %10 = vsyncpa [#allocation4], 0  ;;  %s373_s12 = smov [#allocation5]   ;;  %s374_s14 = smov [#allocation2]  }
   0x3   :  { %s28_s13 = sshll.u32 %s373_s12, 4  ;;  %s16_s15 = sshll.u32 %s374_s14, 4  ;;  %s29_s13 = int_to_ptr.vmem [resolvable:$true] %s28_s13  ;;  %s401_s15 = int_to_ptr.vmem [resolvable:$true] %s16_s15 }
   0x4   :  { %s279_s18 = scalar_lea.hbm %s489_s1, 512 }
   0x5   :  { %p280_p0 = scmp.ne.s32.totalorder %s489_s1, %s279_s18  ;;  %p283_p1 = scmp.lt.u32.totalorder %s279_s18, %s489_s1 }
   0x7   :  { %p285_p2 = pnand %p283_p1, %p280_p0 }
   0x9   :  { %288 = shalt.err (!%p285_p2)
}
   0xa   :  { %s289_s23 = scalar_lea.vmem %s29_s13, 512  ;;  %p294_p4 = scmp.lt.s32.totalorder %s29_s13, %s29_s13 }
   0xb   :  { %p290_p3 = scmp.ne.s32.totalorder %s29_s13, %s289_s23  ;;  %p295_p5 = scmp.lt.s32.totalorder %s289_s23, %s289_s23 }
   0xd   :  { %p296_p6 = por %p295_p5, %p294_p4 }
   0xf   :  { %p297_p7 = pnand %p296_p6, %p290_p3 }
  0x11   :  { %300 = shalt.err (!%p297_p7)
}
  0x12   :  { %s375_s24 = smov 64   ;;  %s376_s25 = smov 4  }
  0x13   :  { %34 = dma.hbm_to_vmem [thread:$0]  %s489_s1, 512, %s29_s13, [#allocation6], %s375_s24, %s375_s24, %s376_s25  }
  0x14   :  { %s301_s30 = scalar_lea.hbm %s488_s0, 128 }
  0x15   :  { %p302_p8 = scmp.ne.s32.totalorder %s488_s0, %s301_s30  ;;  %p305_p9 = scmp.lt.u32.totalorder %s301_s30, %s488_s0 }
  0x17   :  { %p307_p10 = pnand %p305_p9, %p302_p8 }
  0x19   :  { %310 = shalt.err (!%p307_p10)
}
  0x1a   :  { %s311_s8 = scalar_lea.vmem %s401_s15, 128  ;;  %p316_p12 = scmp.lt.s32.totalorder %s401_s15, %s401_s15 }
  0x1b   :  { %p312_p11 = scmp.ne.s32.totalorder %s401_s15, %s311_s8  ;;  %p317_p13 = scmp.lt.s32.totalorder %s311_s8, %s311_s8 }
  0x1d   :  { %p318_p0 = por %p317_p13, %p316_p12 }
  0x1f   :  { %p319_p1 = pnand %p318_p0, %p312_p11 }
  0x21   :  { %322 = shalt.err (!%p319_p1)
}
  0x22   :  { %22 = dma.hbm_to_vmem [thread:$0]  %s488_s0, 128, %s401_s15, [#allocation3], %s375_s24, %s375_s24, %s376_s25  }
  0x23   :  { %s377_s10 = smov [#allocation7]   ;;  %s323_s14 = scalar_lea.hbm %s490_s2, 128 }
  0x24   :  { %s41_s11 = sshll.u32 %s377_s10, 4  ;;  %p324_p2 = scmp.ne.s32.totalorder %s490_s2, %s323_s14  ;;  %s42_s11 = int_to_ptr.vmem [resolvable:$true] %s41_s11 }
  0x25   :  { %p327_p3 = scmp.lt.u32.totalorder %s323_s14, %s490_s2 }
  0x27   :  { %p329_p4 = pnand %p327_p3, %p324_p2 }
  0x29   :  { %332 = shalt.err (!%p329_p4)
}
  0x2a   :  { %s333_s20 = scalar_lea.vmem %s42_s11, 128  ;;  %p338_p6 = scmp.lt.s32.totalorder %s42_s11, %s42_s11 }
  0x2b   :  { %p334_p5 = scmp.ne.s32.totalorder %s42_s11, %s333_s20  ;;  %p339_p7 = scmp.lt.s32.totalorder %s333_s20, %s333_s20 }
  0x2d   :  { %p340_p8 = por %p339_p7, %p338_p6 }
  0x2f   :  { %p341_p9 = pnand %p340_p8, %p334_p5 }
  0x31   :  { %344 = shalt.err (!%p341_p9)
}
  0x32   :  { %44 = dma.hbm_to_vmem [thread:$0]  %s490_s2, 128, %s42_s11, [#allocation6]  }
  0x33   :  { %367 = dma.done.wait [#allocation3], 128  }
  0x34   :  { %368 = vsyncadd [#allocation3], 4294967168 }
  0x35   :  { %369 = dma.done.wait [#allocation6], 640  }
  0x36   :  { %370 = vsyncadd [#allocation6], 4294966656  ;;  %vm82_vm0 = vcmask 1041409   ;;  %vm85_vm1 = vcmask 1042434   ;;  %v57_v0 = vld [vmem:[#allocation5] sm:$0x1] }
  0x37   :  { %vm88_vm2 = vcmask 1043459   ;;  %vm91_vm3 = vcmask 1044484   ;;  %vm94_vm4 = vcmask 1045509   ;;  %vm97_vm5 = vcmask 1046534   ;;  %v58_v1 = vld [vmem:[#allocation5 + $0x4] sm:$0x1] }
  0x38   :  { %v59_v2 = vld [vmem:[#allocation5 + $0x8] sm:$0x1]  ;;  %v60_v3 = vld [vmem:[#allocation5 + $0xc] sm:$0x1]  ;;  %v61_v4 = vld [vmem:[#allocation5 + $0x10] sm:$0x1] }
  0x39   :  { %v62_v5 = vld [vmem:[#allocation5 + $0x14] sm:$0x1]  ;;  %v63_v6 = vld [vmem:[#allocation5 + $0x18] sm:$0x1]  ;;  %v64_v7 = vld [vmem:[#allocation5 + $0x1c] sm:$0x1] }
  0x3a   :  { %v81_v8 = vrot.slane %v58_v1, 7  ;;  %v84_v9 = vrot.slane %v59_v2, 6  ;;  %v87_v10 = vrot.slane %v60_v3, 5  ;;  %vm100_vm6 = vcmask 1047559   ;;  %v109_v16 = vld [vmem:[#allocation5 + $0x1] sm:$0x1] }
  0x3b   :  { %v90_v11 = vrot.slane %v61_v4, 4  ;;  %v93_v12 = vrot.slane %v62_v5, 3  ;;  %v96_v13 = vrot.slane %v63_v6, 2  ;;  %v99_v14 = vrot.slane %v64_v7, 1  ;;  %v110_v17 = vld [vmem:[#allocation5 + $0x5] sm:$0x1] }
  0x3c   :  { %v83_v15 = vsel %vm82_vm0, %v81_v8, %v57_v0  ;;  %v111_v18 = vld [vmem:[#allocation5 + $0x9] sm:$0x1]  ;;  %v112_v20 = vld [vmem:[#allocation5 + $0xd] sm:$0x1]  ;;  %v113_v21 = vld [vmem:[#allocation5 + $0x11] sm:$0x1] }
  0x3d   :  { %v86_v19 = vsel %vm85_vm1, %v84_v9, %v83_v15  ;;  %v114_v22 = vld [vmem:[#allocation5 + $0x15] sm:$0x1]  ;;  %v115_v24 = vld [vmem:[#allocation5 + $0x19] sm:$0x1]  ;;  %v116_v25 = vld [vmem:[#allocation5 + $0x1d] sm:$0x1] }
  0x3e   :  { %v89_v23 = vsel %vm88_vm2, %v87_v10, %v86_v19  ;;  %v133_v26 = vrot.slane %v110_v17, 7  ;;  %v135_v27 = vrot.slane %v111_v18, 6  ;;  %v137_v29 = vrot.slane %v112_v20, 5  ;;  %v448_v32 = vld [vmem:[#allocation7] sm:$0xff]  ;;  %v263_v33 = vld [vmem:[#allocation2] ss:$0 sm:$0xff] }
  0x3f   :  { %v92_v28 = vsel %vm91_vm3, %v90_v11, %v89_v23  ;;  %v139_v30 = vrot.slane %v113_v21, 4  ;;  %v141_v31 = vrot.slane %v114_v22, 3  ;;  %v143_v36 = vrot.slane %v115_v24, 2  ;;  %v155_v38 = vld [vmem:[#allocation5 + $0x6] sm:$0x1]  ;;  %s378_s2 = smov [#allocation8]  }
  0x40   :  { %v95_v34 = vsel %vm94_vm4, %v93_v12, %v92_v28  ;;  %v134_v35 = vsel %vm82_vm0, %v133_v26, %v109_v16  ;;  %v145_v37 = vrot.slane %v116_v25, 1  ;;  %v156_v41 = vld [vmem:[#allocation5 + $0xa] sm:$0x1]  ;;  %v157_v42 = vld [vmem:[#allocation5 + $0xe] sm:$0x1]  ;;  %v178_v53 = vrot.slane %v155_v38, 7 }
  0x41   :  { %v98_v39 = vsel %vm97_vm5, %v96_v13, %v95_v34  ;;  %v136_v40 = vsel %vm85_vm1, %v135_v27, %v134_v35  ;;  %v158_v43 = vld [vmem:[#allocation5 + $0x12] sm:$0x1]  ;;  %v265_v45 = vld [vmem:[#allocation2 + $0x1] ss:$0 sm:$0xff]  ;;  %v154_v47 = vld [vmem:[#allocation5 + $0x2] sm:$0x1] }
  0x42   :  { %v101_v44 = vsel %vm100_vm6, %v99_v14, %v98_v39  ;;  %v138_v46 = vsel %vm88_vm2, %v137_v29, %v136_v40  ;;  %v159_v48 = vld [vmem:[#allocation5 + $0x16] sm:$0x1]  ;;  %v160_v49 = vld [vmem:[#allocation5 + $0x1a] sm:$0x1]  ;;  %v161_v52 = vld [vmem:[#allocation5 + $0x1e] sm:$0x1]  ;;  %v179_v63 = vsel %vm82_vm0, %v178_v53, %v154_v47 }
  0x43   :  { %v103_v50 = vmul.f32 %v263_v33, %v101_v44  ;;  %v140_v51 = vsel %vm91_vm3, %v139_v30, %v138_v46  ;;  %v180_v54 = vrot.slane %v156_v41, 6  ;;  %v199_v55 = vld [vmem:[#allocation5 + $0x3] sm:$0x1]  ;;  %v182_v57 = vrot.slane %v157_v42, 5  ;;  %v200_v60 = vld [vmem:[#allocation5 + $0x7] sm:$0x1] }
  0x44   :  { %v142_v56 = vsel %vm94_vm4, %v141_v31, %v140_v51  ;;  %v184_v58 = vrot.slane %v158_v43, 4  ;;  %v186_v59 = vrot.slane %v159_v48, 3  ;;  %v188_v0 = vrot.slane %v160_v49, 2  ;;  %v201_v1 = vld [vmem:[#allocation5 + $0xb] sm:$0x1]  ;;  %s250_s21 = sshll.u32 %s378_s2, 4  ;;  %s251_s21 = int_to_ptr.vmem [resolvable:$true] %s250_s21 }
  0x45   :  { %v105_v61 = vadd.f32 %v103_v50, %v448_v32  ;;  %v144_v62 = vsel %vm97_vm5, %v143_v36, %v142_v56  ;;  %v202_v2 = vld [vmem:[#allocation5 + $0xf] sm:$0x1]  ;;  %v181_v4 = vsel %vm85_vm1, %v180_v54, %v179_v63  ;;  %v190_v5 = vrot.slane %v161_v52, 1  ;;  %v203_v6 = vld [vmem:[#allocation5 + $0x13] sm:$0x1]  ;;  %s345_s22 = scalar_lea.vmem %s251_s21, 256  ;;  %p350_p11 = scmp.lt.s32.totalorder %s251_s21, %s251_s21 }
  0x46   :  { %v146_v3 = vsel %vm100_vm6, %v145_v37, %v144_v62  ;;  %v204_v7 = vld [vmem:[#allocation5 + $0x17] sm:$0x1]  ;;  %v223_v8 = vrot.slane %v200_v60, 7  ;;  %v183_v10 = vsel %vm88_vm2, %v182_v57, %v181_v4  ;;  %v205_v11 = vld [vmem:[#allocation5 + $0x1b] sm:$0x1]  ;;  %v225_v13 = vrot.slane %v201_v1, 6  ;;  %p346_p10 = scmp.ne.s32.totalorder %s251_s21, %s345_s22  ;;  %p351_p12 = scmp.lt.s32.totalorder %s345_s22, %s345_s22 }
  0x47   :  { %v148_v9 = vmul.f32 %v265_v45, %v146_v3  ;;  %v206_v12 = vld [vmem:[#allocation5 + $0x1f] sm:$0x1]  ;;  %v227_v14 = vrot.slane %v202_v2, 5  ;;  %v185_v15 = vsel %vm91_vm3, %v184_v58, %v183_v10  ;;  %v229_v17 = vrot.slane %v203_v6, 4  ;;  %v264_v19 = vld [vmem:[#allocation2 + $0x4] ss:$0 sm:$0xff] }
  0x48   :  { %v224_v16 = vsel %vm82_vm0, %v223_v8, %v199_v55  ;;  %v231_v18 = vrot.slane %v204_v7, 3  ;;  %v266_v20 = vld [vmem:[#allocation2 + $0x5] ss:$0 sm:$0xff]  ;;  %v267_v22 = vld [vmem:[#allocation2 + $0x2] ss:$0 sm:$0xff]  ;;  %v187_v23 = vsel %vm94_vm4, %v186_v59, %v185_v15  ;;  %v233_v25 = vrot.slane %v205_v11, 2  ;;  %p352_p13 = por %p351_p12, %p350_p11 }
  0x49   :  { %v150_v21 = vadd.f32 %v148_v9, %v105_v61  ;;  %v226_v24 = vsel %vm85_vm1, %v225_v13, %v224_v16  ;;  %v268_v26 = vld [vmem:[#allocation2 + $0x6] ss:$0 sm:$0xff]  ;;  %v189_v27 = vsel %vm97_vm5, %v188_v0, %v187_v23  ;;  %v235_v29 = vrot.slane %v206_v12, 1  ;;  %v269_v36 = vld [vmem:[#allocation2 + $0x3] ss:$0 sm:$0xff] }
  0x4a   :  { %v228_v28 = vsel %vm88_vm2, %v227_v14, %v226_v24  ;;  %v104_v30 = vmul.f32 %v264_v19, %v101_v44  ;;  %v191_v31 = vsel %vm100_vm6, %v190_v5, %v189_v27  ;;  %v149_v34 = vmul.f32 %v266_v20, %v146_v3  ;;  %v270_v40 = vld [vmem:[#allocation2 + $0x7] ss:$0 sm:$0xff]  ;;  %p353_p0 = pnand %p352_p13, %p346_p10 }
  0x4b   :  { %v230_v33 = vsel %vm91_vm3, %v229_v17, %v228_v28  ;;  %v193_v35 = vmul.f32 %v267_v22, %v191_v31  ;;  %v194_v39 = vmul.f32 %v268_v26, %v191_v31  ;;  %vm242_vm7 = vcmask 130048  }
  0x4c   :  { %v232_v37 = vsel %vm94_vm4, %v231_v18, %v230_v33  ;;  %v106_v38 = vadd.f32 %v104_v30, %v448_v32 }
  0x4d   :  { %v234_v41 = vsel %vm97_vm5, %v233_v25, %v232_v37  ;;  %v195_v42 = vadd.f32 %v193_v35, %v150_v21 }
  0x4e   :  { %v236_v43 = vsel %vm100_vm6, %v235_v29, %v234_v41  ;;  %v151_v45 = vadd.f32 %v149_v34, %v106_v38 }
  0x4f   :  { %v238_v44 = vmul.f32 %v269_v36, %v236_v43  ;;  %v239_v46 = vmul.f32 %v270_v40, %v236_v43 }
  0x50   :  { %v196_v47 = vadd.f32 %v194_v39, %v151_v45 }
  0x51   :  { %v240_v48 = vadd.f32 %v238_v44, %v195_v42 }
  0x52   :  { %v241_v49 = vadd.f32 %v239_v46, %v196_v47 }
  0x53   :  { %243 = vst.msk [vmem:[#allocation8] sm:$0xff] %vm242_vm7, %v240_v48 }
  0x54   :  { %244 = vst.msk [vmem:[#allocation8 + $0x8] sm:$0xff] %vm242_vm7, %v241_v49 }
  0x55   :  { %356 = shalt.err (!%p353_p0)
}
  0x56   :  { %s357_s25 = scalar_lea.hbm %s491_s3, 256 }
  0x57   :  { %p358_p1 = scmp.ne.s32.totalorder %s491_s3, %s357_s25  ;;  %p361_p2 = scmp.lt.u32.totalorder %s357_s25, %s491_s3 }
  0x59   :  { %p363_p3 = pnand %p361_p2, %p358_p1 }
  0x5b   :  { %366 = shalt.err (!%p363_p3)
}
  0x5c   :  { %s379_s30 = smov 128   ;;  %s380_s4 = smov 8  }
  0x5d   :  { %256 = dma.vmem_to_hbm [thread:$0]  %s251_s21, 256, %s491_s3, [#allocation4], %s379_s30, %s379_s30, %s380_s4  }
  0x5e   :  { %371 = dma.done.wait [#allocation4], 256  }
  0x5f   :  { %372 = vsyncadd [#allocation4], 4294967040 }
  0x60   :  { %260 = vsyncpa [#allocation3], 1 }
  0x61   :  { %261 = vsyncpa [#allocation6], 1 }
  0x62   :  { %262 = vsyncpa [#allocation4], 1 }

</bundles_post_ra>
